<compile_context>
chip_gen: v7x
topology: tpu7x:2x2x1
jax: 0.10.0
libtpu: 0.0.40
codegen_flags: <defaults>
</compile_context>

<pallas_src>
import jax
import jax.numpy as jnp
from jax.experimental import pallas as pl
from jax.experimental.pallas import tpu as pltpu


def _se_kernel(x_ref, w1_ref, b1_ref, w2_ref, b2_ref, o_ref):
    # x_ref/o_ref: (C, HW) for one batch sample (batch dim squeezed).
    # w1: (R, C); b1: (R, 1); w2: (C, R); b2: (C, 1)
    x = x_ref[...]                                                   # (C, HW)

    # Squeeze: per-channel global average pool (lane reduce), f32 accumulation.
    y = jnp.mean(x.astype(jnp.float32), axis=-1, keepdims=True)      # (C, 1)

    # Excitation: Linear(C->R) + ReLU + Linear(R->C) + Sigmoid. Tiny MXU work.
    h = jnp.dot(w1_ref[...], y, preferred_element_type=jnp.float32) + b1_ref[...]
    h = jnp.maximum(h, 0.0)                                          # (R, 1)
    s = jnp.dot(w2_ref[...], h, preferred_element_type=jnp.float32) + b2_ref[...]
    s = jax.nn.sigmoid(s).astype(x.dtype)                            # (C, 1)

    # Scale: lane-broadcast multiply in the input dtype.
    o_ref[...] = x * s


def se_layer(x_nchw, w1, b1, w2, b2):
    """x_nchw: (B, C, H, W). w1: (R, C) torch-style; w2: (C, R) torch-style."""
    b, c, h, w = x_nchw.shape
    r = w1.shape[0]
    hw = h * w

    # Pure reshape (no transpose / no extra HBM pass): lane axis = H*W.
    x_flat = x_nchw.reshape(b, c, hw)

    w1_2d = jnp.asarray(w1)                 # (R, C) used directly
    w2_2d = jnp.asarray(w2)                 # (C, R) used directly
    b1_2d = jnp.asarray(b1).reshape(r, 1)
    b2_2d = jnp.asarray(b2).reshape(c, 1)

    out = pl.pallas_call(
        _se_kernel,
        out_shape=jax.ShapeDtypeStruct((b, c, hw), x_nchw.dtype),
        grid=(b,),
        in_specs=[
            # One sample per grid step; batch dim squeezed out of the kernel ref.
            pl.BlockSpec((None, c, hw), lambda i: (i, 0, 0)),
            # Weights / biases: constant index_map -> stay resident in VMEM.
            pl.BlockSpec((r, c), lambda i: (0, 0)),
            pl.BlockSpec((r, 1), lambda i: (0, 0)),
            pl.BlockSpec((c, r), lambda i: (0, 0)),
            pl.BlockSpec((c, 1), lambda i: (0, 0)),
        ],
        out_specs=pl.BlockSpec((None, c, hw), lambda i: (i, 0, 0)),
        compiler_params=pltpu.CompilerParams(
            dimension_semantics=("parallel",),
        ),
    )(x_flat, w1_2d, b1_2d, w2_2d, b2_2d)

    return out.reshape(b, c, h, w)


def se_layer_ref(x_nchw, w1, b1, w2, b2):
    """Pure-JAX reference matching the PyTorch forward."""
    y = jnp.mean(x_nchw.astype(jnp.float32), axis=(2, 3))            # (B, C)
    hdn = jnp.maximum(y @ w1.T + b1, 0.0)                            # (B, R)
    s = jax.nn.sigmoid(hdn @ w2.T + b2)                              # (B, C)
    return (x_nchw.astype(jnp.float32) * s[:, :, None, None]).astype(x_nchw.dtype)


if __name__ == "__main__":
    # Shapes consistent with the module: channel=128, reduction=64, batch=2,
    # spatial=16x16 (H*W = 256, a multiple of 128 -> lane-dense stores).
    B, C, H, W = 2, 128, 16, 16
    R = 64  # reduction

    key = jax.random.PRNGKey(0)
    kx, kw1, kb1, kw2, kb2 = jax.random.split(key, 5)

    x = jax.random.normal(kx, (B, C, H, W), dtype=jnp.float32)
    # torch.nn.Linear weight shapes: fc1 (R, C), fc2 (C, R); deterministic init.
    w1 = jax.random.normal(kw1, (R, C), dtype=jnp.float32) * (1.0 / jnp.sqrt(C))
    b1 = jax.random.normal(kb1, (R,), dtype=jnp.float32) * 0.01
    w2 = jax.random.normal(kw2, (C, R), dtype=jnp.float32) * (1.0 / jnp.sqrt(R))
    b2 = jax.random.normal(kb2, (C,), dtype=jnp.float32) * 0.01

    out = se_layer(x, w1, b1, w2, b2)
    out = jax.block_until_ready(out)

    ref = se_layer_ref(x, w1, b1, w2, b2)
    assert out.shape == (B, C, H, W)
    assert jnp.allclose(out, ref, atol=1e-5, rtol=1e-5), "mismatch vs reference"

    print("KERNEL_OK")
</pallas_src>

<mosaic_0001>
module attributes {stable_mosaic.version = 11 : i64} {
  func.func @_se_kernel(%arg0: i32, %arg1: memref<1x128x256xf32, #tpu.memory_space<vmem>>, %arg2: memref<64x128xf32, #tpu.memory_space<vmem>>, %arg3: memref<64x1xf32, #tpu.memory_space<vmem>>, %arg4: memref<128x64xf32, #tpu.memory_space<vmem>>, %arg5: memref<128x1xf32, #tpu.memory_space<vmem>>, %arg6: memref<1x128x256xf32, #tpu.memory_space<vmem>>) attributes {dimension_semantics = [#tpu.dimension_semantics<parallel>], iteration_bounds = array<i64: 2>, scalar_prefetch = 0 : i64, scratch_operands = 0 : i64, tpu.core_type = #tpu.core_type<tc>, window_params = [{transform_indices = @transform_0, window_bounds = array<i64: 1, 128, 256>}, {pipeline_mode = #tpu.pipeline_mode<synchronous>, transform_indices = @transform_1, window_bounds = array<i64: 64, 128>}, {pipeline_mode = #tpu.pipeline_mode<synchronous>, transform_indices = @transform_2, window_bounds = array<i64: 64, 1>}, {pipeline_mode = #tpu.pipeline_mode<synchronous>, transform_indices = @transform_3, window_bounds = array<i64: 128, 64>}, {pipeline_mode = #tpu.pipeline_mode<synchronous>, transform_indices = @transform_4, window_bounds = array<i64: 128, 1>}, {transform_indices = @transform_5, window_bounds = array<i64: 1, 128, 256>}]} {
    %c0 = arith.constant 0 : index
    %c0_0 = arith.constant 0 : index
    %c0_1 = arith.constant 0 : index
    %0 = vector.load %arg1[%c0, %c0_0, %c0_1] : memref<1x128x256xf32, #tpu.memory_space<vmem>>, vector<1x128x256xf32>
    %1 = vector.shape_cast %0 : vector<1x128x256xf32> to vector<128x256xf32>
    %cst = arith.constant dense<0.000000e+00> : vector<128xf32>
    %2 = vector.multi_reduction <add>, %1, %cst [1] : vector<128x256xf32> to vector<128xf32>
    %3 = vector.shape_cast %2 : vector<128xf32> to vector<128x1xf32>
    %cst_2 = arith.constant 2.560000e+02 : f32
    %4 = vector.broadcast %cst_2 : f32 to vector<128x1xf32>
    %5 = arith.divf %3, %4 : vector<128x1xf32>
    %c0_3 = arith.constant 0 : index
    %c0_4 = arith.constant 0 : index
    %6 = vector.load %arg2[%c0_3, %c0_4] : memref<64x128xf32, #tpu.memory_space<vmem>>, vector<64x128xf32>
    %cst_5 = arith.constant dense<0.000000e+00> : vector<64x1xf32>
    %7 = tpu.matmul %6, %5, %cst_5 {dimension_numbers = #tpu.dot_dimension_numbers<[1], [0], [0], [1], [0, 0, 1, 1], [], []>} : vector<64x128xf32>, vector<128x1xf32>, vector<64x1xf32> -> vector<64x1xf32>
    %c0_6 = arith.constant 0 : index
    %c0_7 = arith.constant 0 : index
    %8 = vector.load %arg3[%c0_6, %c0_7] : memref<64x1xf32, #tpu.memory_space<vmem>>, vector<64x1xf32>
    %9 = arith.addf %7, %8 : vector<64x1xf32>
    %cst_8 = arith.constant 0.000000e+00 : f32
    %10 = vector.broadcast %cst_8 : f32 to vector<64x1xf32>
    %11 = arith.maximumf %9, %10 : vector<64x1xf32>
    %c0_9 = arith.constant 0 : index
    %c0_10 = arith.constant 0 : index
    %12 = vector.load %arg4[%c0_9, %c0_10] : memref<128x64xf32, #tpu.memory_space<vmem>>, vector<128x64xf32>
    %cst_11 = arith.constant dense<0.000000e+00> : vector<128x1xf32>
    %13 = tpu.matmul %12, %11, %cst_11 {dimension_numbers = #tpu.dot_dimension_numbers<[1], [0], [0], [1], [0, 0, 1, 1], [], []>} : vector<128x64xf32>, vector<64x1xf32>, vector<128x1xf32> -> vector<128x1xf32>
    %c0_12 = arith.constant 0 : index
    %c0_13 = arith.constant 0 : index
    %14 = vector.load %arg5[%c0_12, %c0_13] : memref<128x1xf32, #tpu.memory_space<vmem>>, vector<128x1xf32>
    %15 = arith.addf %13, %14 : vector<128x1xf32>
    %16 = arith.negf %15 : vector<128x1xf32>
    %17 = math.exp %16 : vector<128x1xf32>
    %cst_14 = arith.constant 1.000000e+00 : f32
    %18 = vector.broadcast %cst_14 : f32 to vector<128x1xf32>
    %19 = arith.addf %18, %17 : vector<128x1xf32>
    %20 = arith.divf %18, %19 : vector<128x1xf32>
    %21 = vector.broadcast %20 : vector<128x1xf32> to vector<128x256xf32>
    %22 = arith.mulf %1, %21 : vector<128x256xf32>
    %c0_15 = arith.constant 0 : index
    %c0_16 = arith.constant 0 : index
    %c0_17 = arith.constant 0 : index
    %23 = vector.load %arg6[%c0_15, %c0_16, %c0_17] : memref<1x128x256xf32, #tpu.memory_space<vmem>>, vector<1x128x256xf32>
    %24 = vector.shape_cast %23 : vector<1x128x256xf32> to vector<128x256xf32>
    %25 = vector.shape_cast %22 : vector<128x256xf32> to vector<1x128x256xf32>
    tpu.vector_store %arg6[%c0_15, %c0_16, %c0_17], %25 {strides = array<i32>} : memref<1x128x256xf32, #tpu.memory_space<vmem>>, vector<1x128x256xf32>,
    return
  }
  func.func @transform_0(%arg0: i32) -> (i32, i32, i32) {
    %c0_i32 = arith.constant 0 : i32
    %c0_i32_0 = arith.constant 0 : i32
    %c0_i32_1 = arith.constant 0 : i32
    return %arg0, %c0_i32, %c0_i32_0 : i32, i32, i32
  }
  func.func @transform_1(%arg0: i32) -> (i32, i32) {
    %c0_i32 = arith.constant 0 : i32
    %c0_i32_0 = arith.constant 0 : i32
    %c0_i32_1 = arith.constant 0 : i32
    return %c0_i32, %c0_i32_0 : i32, i32
  }
  func.func @transform_2(%arg0: i32) -> (i32, i32) {
    %c0_i32 = arith.constant 0 : i32
    %c0_i32_0 = arith.constant 0 : i32
    %c0_i32_1 = arith.constant 0 : i32
    return %c0_i32, %c0_i32_0 : i32, i32
  }
  func.func @transform_3(%arg0: i32) -> (i32, i32) {
    %c0_i32 = arith.constant 0 : i32
    %c0_i32_0 = arith.constant 0 : i32
    %c0_i32_1 = arith.constant 0 : i32
    return %c0_i32, %c0_i32_0 : i32, i32
  }
  func.func @transform_4(%arg0: i32) -> (i32, i32) {
    %c0_i32 = arith.constant 0 : i32
    %c0_i32_0 = arith.constant 0 : i32
    %c0_i32_1 = arith.constant 0 : i32
    return %c0_i32, %c0_i32_0 : i32, i32
  }
  func.func @transform_5(%arg0: i32) -> (i32, i32, i32) {
    %c0_i32 = arith.constant 0 : i32
    %c0_i32_0 = arith.constant 0 : i32
    %c0_i32_1 = arith.constant 0 : i32
    return %arg0, %c0_i32, %c0_i32_0 : i32, i32, i32
  }
}

</mosaic_0001>

<bundles_post_ra>
// kernel: tpu_custom_call.1
= control target key start
LH: loop header
LB: loop body
LE: loop exit
PB: predicated region body
PF: predicated region fallthrough
CT: control target
= control target key end

     0   :  { %10 = vsyncpa [#allocation3], 0  ;;  %s2025_s0 = inlined_call_operand.hbm [shape: f32[2,128,256], index: 0, kind: input, shape index: {}]   ;;  %s2026_s1 = inlined_call_operand.vmem [shape: f32[64,128], index: 1, kind: input, shape index: {}]   ;;  %s2027_s2 = inlined_call_operand.vmem [shape: f32[64,1], index: 2, kind: input, shape index: {}]   ;;  %s2028_s3 = inlined_call_operand.vmem [shape: f32[128,64], index: 3, kind: input, shape index: {}]   ;;  %s2029_s4 = inlined_call_operand.vmem [shape: f32[128,1], index: 4, kind: input, shape index: {}]   ;;  %s2030_s5 = inlined_call_operand.hbm [shape: f32[2,128,256], index: 5, kind: output, shape index: {}]  }
   0x1   :  { %12 = vsyncpa [#allocation3 + $0x1], 0 }
   0x2   :  { %13 = vsyncpa [#allocation4], 0 }
   0x3   :  { %15 = vsyncpa [#allocation4 + $0x1], 0  ;;  %s1502_s18 = smov 0   ;;  %s1504_s19 = smov 0  }
   0x4   :  { %s1506_s20 = smov 0   ;;  %s1508_s21 = smov 0  }
   0x5 LB: > { %s1523_s22 = sadd.s32 4294967295, %s1463_s21   ;;  %s1022_s23 = sadd.s32 4294967294, %s1463_s21   ;;  %s1463_s21 = sphi %s1508_s21, %s2043_s21   ;;  %s1459_s20 = sphi %s1506_s20, %s2042_s20   ;;  %s1455_s19 = sphi %s1504_s19, %s2041_s19   ;;  %s1451_s18 = sphi %s1502_s18, %s2040_s18  }
   0x6   : > { %s1527_s24 = sadd.s32 1, %s1463_s21   ;;  %s28_s25 = sadd.s32 1, %s1459_s20 }
   0x7   : > { %s25_s26 = ssub.s32 %s1463_s21, %s1527_s24  ;;  %p35_p0 = scmp.ne.s32.totalorder %s1459_s20, %s1455_s19 }
   0x8   : > { %p26_p1 = scmp.eq.s32.totalorder %s25_s26, 0  ;;  %p36_p2 = scmp.eq.s32.totalorder %s1463_s21, 0 }
   0x9   : > { %p41_p3 = scmp.ne.s32.totalorder %s1455_s19, %s1451_s18  ;;  %p42_p4 = scmp.eq.s32.totalorder %s1523_s22, 0 }
   0xa   : > { %s1539_s27 = scalar_select %p26_p1, %s1459_s20, %s28_s25  }
   0xb   : > { %p1541_p5 = por %p36_p2, %p35_p0  ;;  %p1545_p6 = por %p42_p4, %p41_p3 }
   0xc   : > { %p149_p7 = scmp.eq.s32.totalorder %s1523_s22, 1  ;;  %p155_p8 = scmp.eq.s32.totalorder %s1022_s23, 1 }
   0xd   : > { %p1262_p10 = scmp.lt.s32.totalorder %s1463_s21, 2  ;;  %s187_s7 = sand.u32 1, %s1459_s20  }
   0xe   : > { %p1552_p11 = por %p149_p7, %p35_p0  ;;  %p1556_p12 = por %p155_p8, %p41_p3 }
   0xf   : > { %s1068_s8 = sshll.u32 %s1463_s21, 12  ;;  %s1025_s9 = sshll.u32 %s187_s7, 8 }
  0x10   : > { %s2034_s30 = scalar_select %p1552_p11, 1, 0 }
  0x11   : > { %s2035_s6 = scalar_select %p1556_p12, 1, 0 }
  0x12   : > { %s1565_s12 = scalar_lea.hbm %s2025_s0, %s1068_s8  ;;  %s191_s13 = scalar_lea.vmem [#allocation2], %s1025_s9 }
  0x13   : > { %s198_s14 = sshll.u32 %s191_s13, 4  ;;  %p1569_p13 = pnand %p1262_p10, %p1541_p5  ;;  %s1573_s14 = int_to_ptr.vmem [resolvable:$true] %s198_s14 }
  0x14   : > { %s1575_s16 = scalar_lea.sflag [#allocation3], %s187_s7  ;;  %s1367_s17 = scalar_lea.hbm %s1565_s12, 4096 }
  0x15   : > { %p1368_p0 = scmp.ne.s32.totalorder %s1565_s12, %s1367_s17  ;;  %p1369_p1 = pneg %p1569_p13 }
  0x16   : > { %s1372_s26 = scalar_lea.hbm %s2025_s0, 8192  ;;  %p1373_p4 = scmp.lt.u32.totalorder %s1565_s12, %s2025_s0 }
  0x17   : > { %p1370_p2 = pnand %p1369_p1, %p1368_p0  ;;  %p1374_p5 = scmp.lt.u32.totalorder %s1372_s26, %s1367_s17 }
  0x18   : > { %p1376_p8 = scmp.lt.u32.totalorder %s1367_s17, %s1565_s12 }
  0x19   : > { %p1371_p3 = pneg %p1370_p2  ;;  %p1375_p7 = por %p1374_p5, %p1373_p4 }
  0x1b   : > { %p1377_p10 = por %p1376_p8, %p1375_p7 }
  0x1d   : > { %p1378_p9 = pnand %p1377_p10, %p1371_p3 }
  0x1f   : > { %1381 = shalt.err (!%p1378_p9)
}
  0x20   : > { %s1382_s7 = scalar_lea.vmem %s1573_s14, 4096  ;;  %s1465_s9 = smov [#allocation2]  }
  0x21   : > { %p1383_p0 = scmp.ne.s32.totalorder %s1573_s14, %s1382_s7  ;;  %s1387_s10 = sshll.u32 %s1465_s9, 4  ;;  %s1388_s10 = int_to_ptr.vmem [resolvable:$false] %s1387_s10 }
  0x22   : > { %s1389_s11 = scalar_lea.vmem %s1388_s10, 8192  ;;  %p1390_p11 = scmp.lt.s32.totalorder %s1573_s14, %s1388_s10 }
  0x23   : > { %p1385_p2 = pnand %p1383_p0, %p1369_p1  ;;  %p1391_p4 = scmp.lt.s32.totalorder %s1389_s11, %s1382_s7 }
  0x25   : > { %p1386_p12 = pneg %p1385_p2  ;;  %p1392_p5 = por %p1391_p4, %p1390_p11 }
  0x27   : > { %p1393_p7 = pnand %p1392_p5, %p1386_p12 }
  0x29   : > { %1396 = shalt.err (!%p1393_p7)
}
  0x2a   : > { %s1466_s13 = smov 256   ;;  %s1467_s17 = smov 16  }
  0x2b   : > { %1257 = dma.hbm_to_vmem [thread:$0]  (!%p1569_p13), %s1565_s12, 4096, %s1573_s14, %s1575_s16, %s1466_s13, %s1466_s13, %s1467_s17  }
  0x2c   : > { %p1028_p9 = scmp.ge.s32.totalorder %s1463_s21, 1  ;;  %p206_p1 = scmp.lt.s32.totalorder %s1463_s21, 3 }
  0x2e   : > { %p207_p3 = pnand %p1028_p9, %p206_p1 }
  0x2f   : > { %s1606_s23 = sand.u32 (!%p207_p3), 1, %s1455_s19  }
  0x30   : > { %210 = sbr.rel (%p207_p3) target bundleno = 902 (0x386), region = 40  ;;  %s1029_s25 = sshll.u32 (!%p207_p3), %s1606_s23, 8 }
  0x31   : > { %s213_s26 = scalar_lea.sflag (!%p207_p3), [#allocation3], %s1606_s23  ;;  %s1612_s28 = scalar_lea.vmem (!%p207_p3), [#allocation2], %s1029_s25 }
  0x37   : > { %1442 = dma.done.wait (%p1545_p6), %s213_s26, 4096  }
  0x38   : > { %1444 = vsyncadd (%p1545_p6), %s213_s26, 4294963200  ;;  %v1619_v0 = vld [vmem:[%s1612_s28 + $0x20] sm:$0xff]  ;;  %v1622_v1 = vld [vmem:[%s1612_s28 + $0x28] sm:$0xff]  ;;  %vm501_vm0 = vcmask 523264   ;;  %s1912_s26 = scalar_lea.vmem [#allocation5], %s1029_s25  ;;  %s1069_s25 = sshll.u32 %s1523_s22, 12 }
  0x39   : > { %v1625_v2 = vld [vmem:[%s1612_s28] sm:$0xff]  ;;  %v281_v3 = vadd.f32 %v1622_v1, %v1619_v0  ;;  %v1630_v4 = vld [vmem:[%s1612_s28 + $0x8] sm:$0xff]  ;;  %v1633_v5 = vld [vmem:[%s1612_s28 + $0x30] sm:$0xff]  ;;  %s1975_s14 = scalar_lea.hbm %s2030_s5, %s1069_s25  ;;  %s936_s22 = scalar_lea.sflag [#allocation4], %s1606_s23 }
  0x3a   : > { %v1636_v6 = vld [vmem:[%s1612_s28 + $0x38] sm:$0xff]  ;;  %v275_v7 = vadd.f32 %v1630_v4, %v1625_v2  ;;  %v1641_v8 = vld [vmem:[%s1612_s28 + $0x10] sm:$0xff]  ;;  %v1657_v14 = vld [vmem:[%s1612_s28 + $0x40] sm:$0xff]  ;;  %p2037_p11 = scmp.ne.s32.totalorder %s2034_s30, 0  ;;  %s1469_s16 = smov [#allocation5]  }
  0x3b   : > { %v1644_v9 = vld [vmem:[%s1612_s28 + $0x18] sm:$0xff]  ;;  %282 = vadd.xlane.f32.xlu1 %v281_v3  ;;  %v284_v10 = vadd.f32 %v1636_v6, %v1633_v5  ;;  %v1651_v12 = vld [vmem:[%s1612_s28 + $0x50] sm:$0xff]  ;;  %v1660_v15 = vld [vmem:[%s1612_s28 + $0x48] sm:$0xff]  ;;  %s1401_s8 = sshll.u32 %s1469_s16, 4  ;;  %s1402_s8 = int_to_ptr.vmem [resolvable:$false] %s1401_s8 }
  0x3c   : > { %276 = vadd.xlane.f32.xlu0 %v275_v7  ;;  %v278_v11 = vadd.f32 %v1644_v9, %v1641_v8  ;;  %v1654_v13 = vld [vmem:[%s1612_s28 + $0x58] sm:$0xff]  ;;  %v287_v17 = vadd.f32 %v1660_v15, %v1657_v14  ;;  %v1667_v18 = vld [vmem:[%s1612_s28 + $0x70] sm:$0xff]  ;;  %v1673_v20 = vld [vmem:[%s1612_s28 + $0x60] sm:$0xff]  ;;  %s1403_s7 = scalar_lea.vmem %s1402_s8, 8192 }
  0x3d   : > { %v290_v16 = vadd.f32 %v1654_v13, %v1651_v12  ;;  %v1670_v19 = vld [vmem:[%s1612_s28 + $0x78] sm:$0xff]  ;;  %v1676_v21 = vld [vmem:[%s1612_s28 + $0x68] sm:$0xff]  ;;  %v1683_v24 = vld [vmem:[%s1612_s28 + $0x90] sm:$0xff] }
  0x3e   : > { %v296_v22 = vadd.f32 %v1670_v19, %v1667_v18  ;;  %v293_v23 = vadd.f32 %v1676_v21, %v1673_v20  ;;  %v1686_v25 = vld [vmem:[%s1612_s28 + $0x98] sm:$0xff]  ;;  %v1689_v26 = vld [vmem:[%s1612_s28 + $0x80] sm:$0xff]  ;;  %v1692_v27 = vld [vmem:[%s1612_s28 + $0x88] sm:$0xff] }
  0x3f   : > { %285 = vadd.xlane.f32.xlu1 %v284_v10  ;;  %v302_v28 = vadd.f32 %v1686_v25, %v1683_v24  ;;  %v299_v29 = vadd.f32 %v1692_v27, %v1689_v26  ;;  %v1699_v30 = vld [vmem:[%s1612_s28 + $0xb0] sm:$0xff]  ;;  %v1702_v31 = vld [vmem:[%s1612_s28 + $0xb8] sm:$0xff]  ;;  %v1705_v32 = vld [vmem:[%s1612_s28 + $0xa0] sm:$0xff] }
  0x40   : > { %279 = vadd.xlane.f32.xlu0 %v278_v11  ;;  %v1708_v33 = vld [vmem:[%s1612_s28 + $0xa8] sm:$0xff]  ;;  %v308_v34 = vadd.f32 %v1702_v31, %v1699_v30  ;;  %v1715_v36 = vld [vmem:[%s1612_s28 + $0xd0] sm:$0xff]  ;;  %v1718_v37 = vld [vmem:[%s1612_s28 + $0xd8] sm:$0xff] }
  0x41   : > { %v305_v35 = vadd.f32 %v1708_v33, %v1705_v32  ;;  %v1721_v38 = vld [vmem:[%s1612_s28 + $0xc0] sm:$0xff]  ;;  %v1724_v39 = vld [vmem:[%s1612_s28 + $0xc8] sm:$0xff]  ;;  %v314_v40 = vadd.f32 %v1718_v37, %v1715_v36  ;;  %v1731_v42 = vld [vmem:[%s1612_s28 + $0xf0] sm:$0xff] }
  0x42   : > { %v311_v41 = vadd.f32 %v1724_v39, %v1721_v38  ;;  %v1734_v43 = vld [vmem:[%s1612_s28 + $0xf8] sm:$0xff]  ;;  %v1737_v44 = vld [vmem:[%s1612_s28 + $0xe0] sm:$0xff]  ;;  %v1740_v45 = vld [vmem:[%s1612_s28 + $0xe8] sm:$0xff]  ;;  %s949_s28 = sshll.u32 %s1912_s26, 4  ;;  %s1977_s28 = int_to_ptr.vmem [resolvable:$true] %s949_s28 }
  0x43   : > { %291 = vadd.xlane.f32.xlu1 %v290_v16  ;;  %v320_v46 = vadd.f32 %v1734_v43, %v1731_v42  ;;  %v317_v47 = vadd.f32 %v1740_v45, %v1737_v44  ;;  %v340_v48 = vld [vmem:[%s2026_s1] sm:$0xff]  ;;  %s1397_s15 = scalar_lea.vmem %s1977_s28, 4096  ;;  %p1404_p8 = scmp.lt.s32.totalorder %s1977_s28, %s1402_s8 }
  0x44   : > { %288 = vadd.xlane.f32.xlu0 %v287_v17  ;;  %1150 = vmatprep.mubr.f32.mxu0 %v340_v48  ;;  %p1398_p6 = scmp.ne.s32.totalorder %s1977_s28, %s1397_s15  ;;  %p1405_p10 = scmp.lt.s32.totalorder %s1403_s7, %s1397_s15 }
  0x46   : > { %p1399_p12 = pnand %p1398_p6, %p2037_p11  ;;  %p1406_p0 = por %p1405_p10, %p1404_p8 }
  0x47   : > { %297 = vadd.xlane.f32.xlu1 %v296_v22 }
  0x48   : > { %294 = vadd.xlane.f32.xlu0 %v293_v23  ;;  %p1400_p13 = pneg %p1399_p12 }
  0x4a   : > { %p1407_p2 = pnand %p1406_p0, %p1400_p13 }
  0x4b   : > { %303 = vadd.xlane.f32.xlu1 %v302_v28 }
  0x4c   : > { %300 = vadd.xlane.f32.xlu0 %v299_v29 }
  0x4f   : > { %309 = vadd.xlane.f32.xlu1 %v308_v34 }
  0x50   : > { %306 = vadd.xlane.f32.xlu0 %v305_v35 }
  0x53   : > { %315 = vadd.xlane.f32.xlu1 %v314_v40 }
  0x54   : > { %312 = vadd.xlane.f32.xlu0 %v311_v41 }
  0x57   : > { %321 = vadd.xlane.f32.xlu1 %v320_v46 }
  0x58   : > { %318 = vadd.xlane.f32.xlu0 %v317_v47 }
  0xc8   : > { %v283_v49 = vpop.xlane.xlu1 %282 }
  0xc9   : > { %v277_v50 = vpop.xlane.xlu0 %276  ;;  %v326_v53 = vmul.f32 0.00390625, %v283_v49 }
  0xca   : > { %v324_v54 = vmul.f32 0.00390625, %v277_v50 }
  0xcc   : > { %v286_v51 = vpop.xlane.xlu1 %285 }
  0xcd   : > { %v280_v52 = vpop.xlane.xlu0 %279  ;;  %v327_v55 = vmul.f32 0.00390625, %v286_v51 }
  0xce   : > { %v325_v56 = vmul.f32 0.00390625, %v280_v52 }
  0xcf   : > { %v1206_v61 = vpack.c.bf16 %v327_v55, %v326_v53 }
  0xd0   : > { %v1202_v57 = vpack.c.bf16 %v325_v56, %v324_v54  ;;  %v292_v58 = vpop.xlane.xlu1 %291 }
  0xd1   : > { %v329_v59 = vmul.f32 0.00390625, %v292_v58  ;;  %v289_v60 = vpop.xlane.xlu0 %288  ;;  %v342_v58 = vld [vmem:[%s2026_s1 + $0x10] sm:$0xff] }
  0xd2   : > { %1203 = vmatprep.subr.bf16.mxu0 %v1202_v57  ;;  %v328_v62 = vmul.f32 0.00390625, %v289_v60  ;;  %v344_v60 = vld [vmem:[%s2026_s1 + $0x20] sm:$0xff] }
  0xd3   : > { %1205 = vmatpush3.bf16.msra.mxu0 %v1202_v57  ;;  %v341_v57 = vld [vmem:[%s2026_s1 + $0x8] sm:$0xff] }
  0xd4   : > { %1207 = vmatprep.subr.bf16.mxu0 %v1206_v61  ;;  %v1210_v63 = vpack.c.bf16 %v329_v59, %v328_v62  ;;  %v298_v3 = vpop.xlane.xlu1 %297  ;;  %v343_v59 = vld [vmem:[%s2026_s1 + $0x18] sm:$0xff]  ;;  %v346_v62 = vld [vmem:[%s2026_s1 + $0x30] sm:$0xff] }
  0xd5   : > { %v331_v7 = vmul.f32 0.00390625, %v298_v3  ;;  %v295_v10 = vpop.xlane.xlu0 %294  ;;  %v469_v3 = vld [vmem:[%s2028_s3] sm:$0xff] }
  0xd6   : > { %v330_v11 = vmul.f32 0.00390625, %v295_v10  ;;  %1178 = vmatprep.mubr.msk.f32.mxu1 %vm501_vm0, %v469_v3  ;;  %v348_v10 = vld [vmem:[%s2027_s2] sm:$0xff] }
  0xd7   : > { %1209 = vmatpush3.bf16.msra.mxu0 %v1206_v61  ;;  %v345_v61 = vld [vmem:[%s2026_s1 + $0x28] sm:$0xff] }
  0xd8   : > { %v1214_v16 = vpack.c.bf16 %v331_v7, %v330_v11  ;;  %1211 = vmatprep.subr.bf16.mxu0 %v1210_v63  ;;  %v304_v17 = vpop.xlane.xlu1 %303  ;;  %v349_v7 = vld [vmem:[%s2027_s2 + $0x8] sm:$0xff] }
  0xd9   : > { %v333_v22 = vmul.f32 0.00390625, %v304_v17  ;;  %v301_v23 = vpop.xlane.xlu0 %300 }
  0xda   : > { %v332_v28 = vmul.f32 0.00390625, %v301_v23  ;;  %v351_v23 = vld [vmem:[%s2027_s2 + $0x18] sm:$0xff] }
  0xdb   : > { %1213 = vmatpush3.bf16.msra.mxu0 %v1210_v63  ;;  %v347_v63 = vld [vmem:[%s2026_s1 + $0x38] sm:$0xff] }
  0xdc   : > { %v1218_v29 = vpack.c.bf16 %v333_v22, %v332_v28  ;;  %1215 = vmatprep.subr.bf16.mxu0 %v1214_v16  ;;  %v310_v34 = vpop.xlane.xlu1 %309 }
  0xdd   : > { %v335_v35 = vmul.f32 0.00390625, %v310_v34  ;;  %v307_v40 = vpop.xlane.xlu0 %306 }
  0xde   : > { %v334_v41 = vmul.f32 0.00390625, %v307_v40 }
  0xdf   : > { %1217 = vmatpush3.bf16.msra.mxu0 %v1214_v16 }
  0xe0   : > { %v1222_v46 = vpack.c.bf16 %v335_v35, %v334_v41  ;;  %1219 = vmatprep.subr.bf16.mxu0 %v1218_v29  ;;  %v316_v47 = vpop.xlane.xlu1 %315 }
  0xe1   : > { %v337_v48 = vmul.f32 0.00390625, %v316_v47  ;;  %v313_v49 = vpop.xlane.xlu0 %312  ;;  %v353_v47 = vld [vmem:[%s2027_s2 + $0x28] sm:$0xff] }
  0xe2   : > { %v336_v50 = vmul.f32 0.00390625, %v313_v49 }
  0xe3   : > { %1221 = vmatpush3.bf16.msra.mxu0 %v1218_v29  ;;  %v350_v29 = vld [vmem:[%s2027_s2 + $0x10] sm:$0xff] }
  0xe4   : > { %v1226_v51 = vpack.c.bf16 %v337_v48, %v336_v50  ;;  %1223 = vmatprep.subr.bf16.mxu0 %v1222_v46  ;;  %v322_v52 = vpop.xlane.xlu1 %321  ;;  %v352_v50 = vld [vmem:[%s2027_s2 + $0x20] sm:$0xff] }
  0xe5   : > { %v339_v53 = vmul.f32 0.00390625, %v322_v52  ;;  %v319_v54 = vpop.xlane.xlu0 %318 }
  0xe6   : > { %v338_v55 = vmul.f32 0.00390625, %v319_v54 }
  0xe7   : > { %1225 = vmatpush3.bf16.msra.mxu0 %v1222_v46 }
  0xe8   : > { %v1230_v56 = vpack.c.bf16 %v339_v53, %v338_v55  ;;  %1227 = vmatprep.subr.bf16.mxu0 %v1226_v51 }
  0xeb   : > { %1229 = vmatpush3.bf16.msra.mxu0 %v1226_v51 }
  0xec   : > { %1231 = vmatprep.subr.bf16.mxu0 %v1230_v56 }
  0xef   : > { %1233 = vmatpush3.bf16.msra.mxu0 %v1230_v56 }
  0xf2   : > { %1151 = vmatmul.mubr.f32.vlgmr.msra.gmra.mrb[0].mxu0 %v341_v57  ;;  %v355_v57 = vld [vmem:[%s2027_s2 + $0x38] sm:$0xff] }
  0xf3   : > { %1153 = vmatprep.mubr.f32.mxu0 %v342_v58 }
  0xf6   : > { %1154 = vmatmul.mubr.f32.gmra.mrb[2].mxu0 %v343_v59  ;;  %v354_v59 = vld [vmem:[%s2027_s2 + $0x30] sm:$0xff] }
  0xf7   : > { %1156 = vmatprep.mubr.f32.mxu0 %v344_v60 }
  0xfa   : > { %1157 = vmatmul.mubr.f32.gmra.mrb[4].mxu0 %v345_v61 }
  0xfb   : > { %1159 = vmatprep.mubr.f32.mxu0 %v346_v62 }
  0xfe   : > { %1160 = vmatmul.mubr.f32.gmra.mrb[6].mxu0 %v347_v63 }
 0x1c5   : > { %v1152_v11 = vpop.f32.mrb[0].mxu0 }
 0x1c6   : > { %v428_v16 = vadd.f32 %v1152_v11, %v349_v7  ;;  %v422_v17 = vpop.f32.mrb[1].mxu0 }
 0x1c7   : > { %v423_v22 = vadd.f32 %v422_v17, %v348_v10  ;;  %v470_v17 = vld [vmem:[%s2028_s3 + $0x8] sm:$0xff] }
 0x1c8   : > { %v462_v28 = vmax.f32 %v428_v16, 0.0 }
 0x1c9   : > { %v461_v34 = vmax.f32 %v423_v22, 0.0  ;;  %v1155_v35 = vpop.f32.mrb[2].mxu0  ;;  %v471_v22 = vld [vmem:[%s2028_s3 + $0x10] sm:$0xff] }
 0x1ca   : > { %v438_v40 = vadd.f32 %v1155_v35, %v351_v23  ;;  %v432_v41 = vpop.f32.mrb[3].mxu0  ;;  %v472_v23 = vld [vmem:[%s2028_s3 + $0x18] sm:$0xff] }
 0x1cb   : > { %v433_v46 = vadd.f32 %v432_v41, %v350_v29  ;;  %v1234_v48 = vpack.c.bf16 %v462_v28, %v461_v34  ;;  %v473_v28 = vld [vmem:[%s2028_s3 + $0x20] sm:$0xff]  ;;  %v474_v29 = vld [vmem:[%s2028_s3 + $0x28] sm:$0xff]  ;;  %v475_v34 = vld [vmem:[%s2028_s3 + $0x30] sm:$0xff] }
 0x1cc   : > { %v464_v49 = vmax.f32 %v438_v40, 0.0  ;;  %v476_v35 = vld [vmem:[%s2028_s3 + $0x38] sm:$0xff]  ;;  %v477_v40 = vld [vmem:[%s2028_s3 + $0x40] sm:$0xff]  ;;  %v478_v41 = vld [vmem:[%s2028_s3 + $0x48] sm:$0xff] }
 0x1cd   : > { %v463_v51 = vmax.f32 %v433_v46, 0.0  ;;  %v1158_v52 = vpop.f32.mrb[4].mxu0  ;;  %1235 = vmatprep.subr.bf16.mxu1 %v1234_v48  ;;  %v479_v46 = vld [vmem:[%s2028_s3 + $0x50] sm:$0xff] }
 0x1ce   : > { %v448_v53 = vadd.f32 %v1158_v52, %v353_v47  ;;  %v442_v54 = vpop.f32.mrb[5].mxu0  ;;  %1237 = vmatpush3.bf16.msra.mxu1 %v1234_v48  ;;  %v480_v47 = vld [vmem:[%s2028_s3 + $0x58] sm:$0xff]  ;;  %v481_v48 = vld [vmem:[%s2028_s3 + $0x60] sm:$0xff]  ;;  %v1468_v52 = vmov 0  }
 0x1cf   : > { %v1238_v55 = vpack.c.bf16 %v464_v49, %v463_v51  ;;  %v443_v56 = vadd.f32 %v442_v54, %v352_v50  ;;  %v482_v49 = vld [vmem:[%s2028_s3 + $0x68] sm:$0xff]  ;;  %v483_v50 = vld [vmem:[%s2028_s3 + $0x70] sm:$0xff]  ;;  %v484_v51 = vld [vmem:[%s2028_s3 + $0x78] sm:$0xff]  ;;  %1301 = vset.pattern.permute.xlu1 %v1468_v52  ;;  %1302 = vset.pattern.permute.xlu0 %v1468_v52 }
 0x1d0   : > { %v466_v58 = vmax.f32 %v448_v53, 0.0  ;;  %v486_v53 = vld [vmem:[%s2029_s4 + $0x8] sm:$0xff]  ;;  %v485_v54 = vld [vmem:[%s2029_s4] sm:$0xff] }
 0x1d1   : > { %v465_v60 = vmax.f32 %v443_v56, 0.0  ;;  %v1161_v61 = vpop.f32.mrb[6].mxu0  ;;  %1239 = vmatprep.subr.bf16.mxu1 %v1238_v55 }
 0x1d2   : > { %v458_v62 = vadd.f32 %v1161_v61, %v355_v57  ;;  %v452_v63 = vpop.f32.mrb[7].mxu0  ;;  %1241 = vmatpush3.bf16.msra.mxu1 %v1238_v55  ;;  %v487_v61 = vld [vmem:[%s2029_s4 + $0x10] sm:$0xff] }
 0x1d3   : > { %v1242_v3 = vpack.c.bf16 %v466_v58, %v465_v60  ;;  %v453_v7 = vadd.f32 %v452_v63, %v354_v59  ;;  %v488_v59 = vld [vmem:[%s2029_s4 + $0x18] sm:$0xff] }
 0x1d4   : > { %v468_v10 = vmax.f32 %v458_v62, 0.0 }
 0x1d5   : > { %v467_v11 = vmax.f32 %v453_v7, 0.0  ;;  %1243 = vmatprep.subr.bf16.mxu1 %v1242_v3 }
 0x1d6   : > { %1245 = vmatpush3.bf16.msra.mxu1 %v1242_v3 }
 0x1d7   : > { %v1246_v16 = vpack.c.bf16 %v468_v10, %v467_v11  ;;  %v490_v11 = vld [vmem:[%s2029_s4 + $0x28] sm:$0xff] }
 0x1d9   : > { %1247 = vmatprep.subr.bf16.mxu1 %v1246_v16 }
 0x1da   : > { %1249 = vmatpush3.bf16.msra.mxu1 %v1246_v16 }
 0x1dd   : > { %1179 = vmatmul.mubr.msk.f32.vlgmr.msra.gmra.mrb[0].mxu1 %vm501_vm0, %v470_v17  ;;  %v489_v17 = vld [vmem:[%s2029_s4 + $0x20] sm:$0xff] }
 0x1de   : > { %1181 = vmatprep.mubr.msk.f32.mxu1 %vm501_vm0, %v471_v22 }
 0x1e1   : > { %1182 = vmatmul.mubr.msk.f32.gmra.mrb[2].mxu1 %vm501_vm0, %v472_v23 }
 0x1e2   : > { %1184 = vmatprep.mubr.msk.f32.mxu1 %vm501_vm0, %v473_v28 }
 0x1e5   : > { %1185 = vmatmul.mubr.msk.f32.gmra.mrb[4].mxu1 %vm501_vm0, %v474_v29 }
 0x1e6   : > { %1187 = vmatprep.mubr.msk.f32.mxu1 %vm501_vm0, %v475_v34 }
 0x1e9   : > { %1188 = vmatmul.mubr.msk.f32.gmra.mrb[6].mxu1 %vm501_vm0, %v476_v35  ;;  %v492_v35 = vld [vmem:[%s2029_s4 + $0x38] sm:$0xff] }
 0x1ea   : > { %1190 = vmatprep.mubr.msk.f32.mxu1 %vm501_vm0, %v477_v40 }
 0x1ed   : > { %1191 = vmatmul.mubr.msk.f32.gmra.mrb[8].mxu1 %vm501_vm0, %v478_v41 }
 0x1ee   : > { %1193 = vmatprep.mubr.msk.f32.mxu1 %vm501_vm0, %v479_v46 }
 0x1f1   : > { %1194 = vmatmul.mubr.msk.f32.gmra.mrb[10].mxu1 %vm501_vm0, %v480_v47 }
 0x1f2   : > { %1196 = vmatprep.mubr.msk.f32.mxu1 %vm501_vm0, %v481_v48 }
 0x1f5   : > { %1197 = vmatmul.mubr.msk.f32.gmra.mrb[12].mxu1 %vm501_vm0, %v482_v49  ;;  %v491_v49 = vld [vmem:[%s2029_s4 + $0x30] sm:$0xff] }
 0x1f6   : > { %1199 = vmatprep.mubr.msk.f32.mxu1 %vm501_vm0, %v483_v50  ;;  %v494_v50 = vld [vmem:[%s2029_s4 + $0x48] sm:$0xff] }
 0x1f9   : > { %1200 = vmatmul.mubr.msk.f32.gmra.mrb[14].mxu1 %vm501_vm0, %v484_v51 }
 0x2b0   : > { %v1180_v55 = vpop.f32.mrb[0].mxu1 }
 0x2b1   : > { %v622_v56 = vadd.f32 %v1180_v55, %v486_v53  ;;  %v616_v57 = vpop.f32.mrb[1].mxu1 }
 0x2b2   : > { %v617_v58 = vadd.f32 %v616_v57, %v485_v54  ;;  %v493_v57 = vld [vmem:[%s2029_s4 + $0x40] sm:$0xff] }
 0x2b3   : > { %v1048_v60 = vmul.f32 -1.442695, %v622_v56 }
 0x2b4   : > { %v1047_v62 = vmul.f32 -1.442695, %v617_v58  ;;  %v1183_v63 = vpop.f32.mrb[2].mxu1 }
 0x2b5   : > { %1303 = vpow2.f32 %v1048_v60  ;;  %v632_v3 = vadd.f32 %v1183_v63, %v488_v59  ;;  %v626_v7 = vpop.f32.mrb[3].mxu1 }
 0x2b6   : > { %1305 = vpow2.f32 %v1047_v62  ;;  %v627_v10 = vadd.f32 %v626_v7, %v487_v61  ;;  %v496_v61 = vld [vmem:[%s2029_s4 + $0x58] sm:$0xff]  ;;  %v495_v7 = vld [vmem:[%s2029_s4 + $0x50] sm:$0xff] }
 0x2b7   : > { %v1050_v16 = vmul.f32 -1.442695, %v632_v3 }
 0x2b8   : > { %v1049_v22 = vmul.f32 -1.442695, %v627_v10  ;;  %v1186_v23 = vpop.f32.mrb[4].mxu1 }
 0x2b9   : > { %1307 = vpow2.f32 %v1050_v16  ;;  %v642_v28 = vadd.f32 %v1186_v23, %v490_v11  ;;  %v636_v29 = vpop.f32.mrb[5].mxu1 }
 0x2ba   : > { %1309 = vpow2.f32 %v1049_v22  ;;  %v637_v34 = vadd.f32 %v636_v29, %v489_v17 }
 0x2bb   : > { %v1052_v40 = vmul.f32 -1.442695, %v642_v28 }
 0x2bc   : > { %v1051_v41 = vmul.f32 -1.442695, %v637_v34  ;;  %v1189_v46 = vpop.f32.mrb[6].mxu1  ;;  %v498_v34 = vld [vmem:[%s2029_s4 + $0x68] sm:$0xff] }
 0x2bd   : > { %1311 = vpow2.f32 %v1052_v40  ;;  %v652_v47 = vadd.f32 %v1189_v46, %v492_v35  ;;  %v646_v48 = vpop.f32.mrb[7].mxu1  ;;  %v497_v46 = vld [vmem:[%s2029_s4 + $0x60] sm:$0xff] }
 0x2be   : > { %1313 = vpow2.f32 %v1051_v41  ;;  %v647_v55 = vadd.f32 %v646_v48, %v491_v49 }
 0x2bf   : > { %v1304_v51 = vpop.eup %1303  ;;  %v1054_v52 = vmul.f32 -1.442695, %v652_v47 }
 0x2c0   : > { %v1306_v53 = vpop.eup %1305  ;;  %v744_v54 = vadd.f32 1.0, %v1304_v51  ;;  %v1192_v56 = vpop.f32.mrb[8].mxu1  ;;  %v1053_v16 = vmul.f32 -1.442695, %v647_v55 }
 0x2c1   : > { %v743_v58 = vadd.f32 1.0, %v1306_v53  ;;  %1315 = vpow2.f32 %v1054_v52  ;;  %v662_v59 = vadd.f32 %v1192_v56, %v494_v50  ;;  %v656_v60 = vpop.f32.mrb[9].mxu1 }
 0x2c2   : > { %1317 = vrcp.f32 %v744_v54  ;;  %v657_v3 = vadd.f32 %v656_v60, %v493_v57  ;;  %v500_v54 = vld [vmem:[%s2029_s4 + $0x78] sm:$0xff]  ;;  %v499_v60 = vld [vmem:[%s2029_s4 + $0x70] sm:$0xff] }
 0x2c3   : > { %v1308_v62 = vpop.eup %1307  ;;  %1319 = vrcp.f32 %v743_v58  ;;  %v1056_v63 = vmul.f32 -1.442695, %v662_v59 }
 0x2c4   : > { %v1310_v10 = vpop.eup %1309  ;;  %v746_v11 = vadd.f32 1.0, %v1308_v62  ;;  %v1195_v17 = vpop.f32.mrb[10].mxu1  ;;  %v1055_v40 = vmul.f32 -1.442695, %v657_v3 }
 0x2c5   : > { %1321 = vpow2.f32 %v1056_v63  ;;  %v672_v22 = vadd.f32 %v1195_v17, %v496_v61  ;;  %v666_v23 = vpop.f32.mrb[11].mxu1  ;;  %v745_v28 = vadd.f32 1.0, %v1310_v10 }
 0x2c6   : > { %1323 = vrcp.f32 %v746_v11  ;;  %v667_v29 = vadd.f32 %v666_v23, %v495_v7 }
 0x2c7   : > { %v1312_v35 = vpop.eup %1311  ;;  %v1058_v41 = vmul.f32 -1.442695, %v672_v22  ;;  %1325 = vpow2.f32 %v1053_v16 }
 0x2c8   : > { %v748_v47 = vadd.f32 1.0, %v1312_v35  ;;  %v1198_v48 = vpop.f32.mrb[12].mxu1  ;;  %v1314_v49 = vpop.eup %1313  ;;  %v1057_v52 = vmul.f32 -1.442695, %v667_v29 }
 0x2c9   : > { %1327 = vpow2.f32 %v1058_v41  ;;  %v682_v50 = vadd.f32 %v1198_v48, %v498_v34  ;;  %v676_v51 = vpop.f32.mrb[13].mxu1  ;;  %v747_v58 = vadd.f32 1.0, %v1314_v49 }
 0x2ca   : > { %1329 = vrcp.f32 %v745_v28  ;;  %v677_v53 = vadd.f32 %v676_v51, %v497_v46 }
 0x2cb   : > { %v1316_v55 = vpop.eup %1315  ;;  %1331 = vpow2.f32 %v1055_v40  ;;  %v1060_v56 = vmul.f32 -1.442695, %v682_v50 }
 0x2cc   : > { %v1318_v57 = vpop.eup %1317  ;;  %1333 = vrcp.f32 %v748_v47  ;;  %v1201_v59 = vpop.f32.mrb[14].mxu1  ;;  %v1059_v62 = vmul.f32 -1.442695, %v677_v53  ;;  %v750_v17 = vadd.f32 1.0, %v1316_v55 }
 0x2cd   : > { %v1320_v61 = vpop.eup %1319  ;;  %1335 = vpow2.f32 %v1060_v56  ;;  %v692_v63 = vadd.f32 %v1201_v59, %v500_v54  ;;  %798 = vperm.xlu1 %1301, %v1318_v57   ;;  %v686_v3 = vpop.f32.mrb[15].mxu1 }
 0x2ce   : > { %1337 = vpow2.f32 %v1057_v52  ;;  %793 = vperm.xlu0 %1302, %v1320_v61   ;;  %v687_v11 = vadd.f32 %v686_v3, %v499_v60 }
 0x2cf   : > { %v1322_v7 = vpop.eup %1321  ;;  %v1062_v10 = vmul.f32 -1.442695, %v692_v63  ;;  %1339 = vrcp.f32 %v747_v58 }
 0x2d0   : > { %v1324_v16 = vpop.eup %1323  ;;  %v752_v22 = vadd.f32 1.0, %v1322_v7  ;;  %1341 = vpow2.f32 %v1059_v62  ;;  %v1061_v29 = vmul.f32 -1.442695, %v687_v11 }
 0x2d1   : > { %808 = vperm.xlu1 %1301, %v1324_v16   ;;  %v1326_v23 = vpop.eup %1325 }
 0x2d2   : > { %1343 = vrcp.f32 %v752_v22  ;;  %v749_v41 = vadd.f32 1.0, %v1326_v23 }
 0x2d3   : > { %v1328_v28 = vpop.eup %1327  ;;  %1345 = vpow2.f32 %v1062_v10 }
 0x2d4   : > { %v1330_v34 = vpop.eup %1329  ;;  %1347 = vrcp.f32 %v750_v17  ;;  %v754_v35 = vadd.f32 1.0, %v1328_v28 }
 0x2d5   : > { %v1332_v40 = vpop.eup %1331  ;;  %803 = vperm.xlu1 %1301, %v1330_v34  }
 0x2d6   : > { %v1334_v46 = vpop.eup %1333  ;;  %1349 = vrcp.f32 %v754_v35  ;;  %v751_v49 = vadd.f32 1.0, %v1332_v40 }
 0x2d7   : > { %v1336_v47 = vpop.eup %1335  ;;  %1351 = vpow2.f32 %v1061_v29 }
 0x2d8   : > { %v1338_v48 = vpop.eup %1337  ;;  %v756_v50 = vadd.f32 1.0, %v1336_v47  ;;  %1353 = vrcp.f32 %v749_v41 }
 0x2d9   : > { %818 = vperm.xlu1 %1301, %v1334_v46   ;;  %v1340_v51 = vpop.eup %1339  ;;  %v753_v53 = vadd.f32 1.0, %v1338_v48 }
 0x2da   : > { %1355 = vrcp.f32 %v756_v50  ;;  %v1342_v52 = vpop.eup %1341 }
 0x2db   : > { %1357 = vrcp.f32 %v751_v49  ;;  %v755_v59 = vadd.f32 1.0, %v1342_v52 }
 0x2dc   : > { %v1344_v54 = vpop.eup %1343  ;;  %1359 = vrcp.f32 %v753_v53 }
 0x2dd   : > { %v1346_v55 = vpop.eup %1345  ;;  %813 = vperm.xlu1 %1301, %v1340_v51   ;;  %838 = vperm.xlu0 %1302, %v1344_v54  }
 0x2de   : > { %v1348_v56 = vpop.eup %1347  ;;  %v758_v57 = vadd.f32 1.0, %v1346_v55 }
 0x2e0   : > { %v1350_v58 = vpop.eup %1349  ;;  %1361 = vrcp.f32 %v758_v57 }
 0x2e1   : > { %v1352_v60 = vpop.eup %1351  ;;  %828 = vperm.xlu1 %1301, %v1348_v56   ;;  %848 = vperm.xlu0 %1302, %v1350_v58   ;;  %1363 = vrcp.f32 %v755_v59 }
 0x2e2   : > { %v1354_v61 = vpop.eup %1353  ;;  %v757_v63 = vadd.f32 1.0, %v1352_v60 }
 0x2e4   : > { %v1356_v62 = vpop.eup %1355  ;;  %1365 = vrcp.f32 %v757_v63 }
 0x2e5   : > { %823 = vperm.xlu1 %1301, %v1354_v61   ;;  %858 = vperm.xlu0 %1302, %v1356_v62   ;;  %v1358_v3 = vpop.eup %1357 }
 0x2e6   : > { %v1360_v7 = vpop.eup %1359 }
 0x2e9   : > { %833 = vperm.xlu1 %1301, %v1358_v3  }
 0x2ea   : > { %v1362_v10 = vpop.eup %1361 }
 0x2eb   : > { %868 = vperm.xlu0 %1302, %v1362_v10   ;;  %v1364_v11 = vpop.eup %1363 }
 0x2ed   : > { %843 = vperm.xlu1 %1301, %v1360_v7  }
 0x2ee   : > { %v1366_v16 = vpop.eup %1365 }
 0x2f1   : > { %853 = vperm.xlu1 %1301, %v1364_v11  }
 0x2f5   : > { %863 = vperm.xlu1 %1301, %v1366_v16  }
 0x34c   : > { %v799_v17 = vpop.permute.xlu1 %798 }
 0x34d   : > { %v873_v22 = vmul.f32 %v799_v17, %v1641_v8  ;;  %v874_v23 = vmul.f32 %v799_v17, %v1644_v9  ;;  %v794_v28 = vpop.permute.xlu0 %793 }
 0x34e   : > { %v871_v29 = vmul.f32 %v794_v28, %v1625_v2  ;;  %v872_v34 = vmul.f32 %v794_v28, %v1630_v4 }
 0x34f   : > { %905 = vst [vmem:[%s1912_s26 + $0x10] sm:$0xff] %v873_v22  ;;  %906 = vst [vmem:[%s1912_s26 + $0x18] sm:$0xff] %v874_v23 }
 0x350   : > { %903 = vst [vmem:[%s1912_s26] sm:$0xff] %v871_v29  ;;  %904 = vst [vmem:[%s1912_s26 + $0x8] sm:$0xff] %v872_v34  ;;  %v809_v2 = vpop.permute.xlu1 %808 }
 0x351   : > { %v877_v4 = vmul.f32 %v809_v2, %v1633_v5  ;;  %v878_v8 = vmul.f32 %v809_v2, %v1636_v6 }
 0x353   : > { %909 = vst [vmem:[%s1912_s26 + $0x30] sm:$0xff] %v877_v4  ;;  %910 = vst [vmem:[%s1912_s26 + $0x38] sm:$0xff] %v878_v8 }
 0x354   : > { %v804_v9 = vpop.permute.xlu1 %803 }
 0x355   : > { %v875_v35 = vmul.f32 %v804_v9, %v1619_v0  ;;  %v876_v40 = vmul.f32 %v804_v9, %v1622_v1 }
 0x357   : > { %907 = vst [vmem:[%s1912_s26 + $0x20] sm:$0xff] %v875_v35  ;;  %908 = vst [vmem:[%s1912_s26 + $0x28] sm:$0xff] %v876_v40 }
 0x358   : > { %v819_v41 = vpop.permute.xlu1 %818 }
 0x359   : > { %v881_v46 = vmul.f32 %v819_v41, %v1651_v12  ;;  %v882_v5 = vmul.f32 %v819_v41, %v1654_v13 }
 0x35b   : > { %913 = vst [vmem:[%s1912_s26 + $0x50] sm:$0xff] %v881_v46  ;;  %914 = vst [vmem:[%s1912_s26 + $0x58] sm:$0xff] %v882_v5 }
 0x35c   : > { %v814_v6 = vpop.permute.xlu1 %813  ;;  %v839_v47 = vpop.permute.xlu0 %838 }
 0x35d   : > { %v879_v0 = vmul.f32 %v814_v6, %v1657_v14  ;;  %v880_v1 = vmul.f32 %v814_v6, %v1660_v15  ;;  %v889_v48 = vmul.f32 %v839_v47, %v1683_v24  ;;  %v890_v49 = vmul.f32 %v839_v47, %v1686_v25 }
 0x35f   : > { %911 = vst [vmem:[%s1912_s26 + $0x40] sm:$0xff] %v879_v0  ;;  %912 = vst [vmem:[%s1912_s26 + $0x48] sm:$0xff] %v880_v1 }
 0x360   : > { %921 = vst [vmem:[%s1912_s26 + $0x90] sm:$0xff] %v889_v48  ;;  %922 = vst [vmem:[%s1912_s26 + $0x98] sm:$0xff] %v890_v49  ;;  %v829_v12 = vpop.permute.xlu1 %828  ;;  %v849_v13 = vpop.permute.xlu0 %848 }
 0x361   : > { %v885_v50 = vmul.f32 %v829_v12, %v1667_v18  ;;  %v886_v14 = vmul.f32 %v829_v12, %v1670_v19  ;;  %v893_v15 = vmul.f32 %v849_v13, %v1699_v30  ;;  %v894_v24 = vmul.f32 %v849_v13, %v1702_v31 }
 0x363   : > { %917 = vst [vmem:[%s1912_s26 + $0x70] sm:$0xff] %v885_v50  ;;  %918 = vst [vmem:[%s1912_s26 + $0x78] sm:$0xff] %v886_v14 }
 0x364   : > { %925 = vst [vmem:[%s1912_s26 + $0xb0] sm:$0xff] %v893_v15  ;;  %926 = vst [vmem:[%s1912_s26 + $0xb8] sm:$0xff] %v894_v24  ;;  %v824_v25 = vpop.permute.xlu1 %823  ;;  %v859_v51 = vpop.permute.xlu0 %858 }
 0x365   : > { %v883_v52 = vmul.f32 %v824_v25, %v1673_v20  ;;  %v884_v18 = vmul.f32 %v824_v25, %v1676_v21  ;;  %v897_v19 = vmul.f32 %v859_v51, %v1715_v36  ;;  %v898_v30 = vmul.f32 %v859_v51, %v1718_v37 }
 0x367   : > { %915 = vst [vmem:[%s1912_s26 + $0x60] sm:$0xff] %v883_v52  ;;  %916 = vst [vmem:[%s1912_s26 + $0x68] sm:$0xff] %v884_v18 }
 0x368   : > { %929 = vst [vmem:[%s1912_s26 + $0xd0] sm:$0xff] %v897_v19  ;;  %930 = vst [vmem:[%s1912_s26 + $0xd8] sm:$0xff] %v898_v30  ;;  %v834_v31 = vpop.permute.xlu1 %833 }
 0x369   : > { %v887_v53 = vmul.f32 %v834_v31, %v1689_v26  ;;  %v888_v54 = vmul.f32 %v834_v31, %v1692_v27 }
 0x36a   : > { %v869_v20 = vpop.permute.xlu0 %868 }
 0x36b   : > { %919 = vst [vmem:[%s1912_s26 + $0x80] sm:$0xff] %v887_v53  ;;  %920 = vst [vmem:[%s1912_s26 + $0x88] sm:$0xff] %v888_v54  ;;  %v901_v21 = vmul.f32 %v869_v20, %v1731_v42  ;;  %v902_v36 = vmul.f32 %v869_v20, %v1734_v43 }
 0x36c   : > { %v844_v37 = vpop.permute.xlu1 %843 }
 0x36d   : > { %933 = vst [vmem:[%s1912_s26 + $0xf0] sm:$0xff] %v901_v21  ;;  %934 = vst [vmem:[%s1912_s26 + $0xf8] sm:$0xff] %v902_v36  ;;  %v891_v55 = vmul.f32 %v844_v37, %v1705_v32  ;;  %v892_v26 = vmul.f32 %v844_v37, %v1708_v33 }
 0x36f   : > { %923 = vst [vmem:[%s1912_s26 + $0xa0] sm:$0xff] %v891_v55  ;;  %924 = vst [vmem:[%s1912_s26 + $0xa8] sm:$0xff] %v892_v26 }
 0x370   : > { %v854_v27 = vpop.permute.xlu1 %853 }
 0x371   : > { %v895_v56 = vmul.f32 %v854_v27, %v1721_v38  ;;  %v896_v42 = vmul.f32 %v854_v27, %v1724_v39 }
 0x373   : > { %927 = vst [vmem:[%s1912_s26 + $0xc0] sm:$0xff] %v895_v56  ;;  %928 = vst [vmem:[%s1912_s26 + $0xc8] sm:$0xff] %v896_v42 }
 0x374   : > { %v864_v43 = vpop.permute.xlu1 %863 }
 0x375   : > { %v899_v32 = vmul.f32 %v864_v43, %v1737_v44  ;;  %v900_v33 = vmul.f32 %v864_v43, %v1740_v45 }
 0x377   : > { %931 = vst [vmem:[%s1912_s26 + $0xe0] sm:$0xff] %v899_v32  ;;  %932 = vst [vmem:[%s1912_s26 + $0xe8] sm:$0xff] %v900_v33 }
 0x378   : > { %1410 = shalt.err (!%p1407_p2)
}
 0x379   : > { %s1411_s9 = scalar_lea.hbm %s1975_s14, 4096  ;;  %s1415_s13 = scalar_lea.hbm %s2030_s5, 8192 }
 0x37a   : > { %p1412_p4 = scmp.ne.s32.totalorder %s1975_s14, %s1411_s9  ;;  %p1416_p9 = scmp.lt.u32.totalorder %s1975_s14, %s2030_s5 }
 0x37b   : > { %p1417_p1 = scmp.lt.u32.totalorder %s1415_s13, %s1411_s9  ;;  %p1419_p6 = scmp.lt.u32.totalorder %s1411_s9, %s1975_s14 }
 0x37c   : > { %p1413_p5 = pnand %p1412_p4, %p2037_p11 }
 0x37d   : > { %p1418_p3 = por %p1417_p1, %p1416_p9 }
 0x37e   : > { %p1414_p7 = pneg %p1413_p5 }
 0x37f   : > { %p1420_p12 = por %p1419_p6, %p1418_p3 }
 0x381   : > { %p1421_p13 = pnand %p1420_p12, %p1414_p7 }
 0x383   : > { %1424 = shalt.err (!%p1421_p13)
}
 0x384   : > { %s1470_s25 = smov 256   ;;  %s1471_s29 = smov 16  }
 0x385   : > { %1252 = dma.vmem_to_hbm [thread:$0]  (%p2037_p11), %s1977_s28, 4096, %s1975_s14, %s936_s22, %s1470_s25, %s1470_s25, %s1471_s29  }
 0x386 PF: > { %s964_s12 = sand.u32 1, %s1451_s18   ;;  %p2038_p8 = scmp.ne.s32.totalorder %s2035_s6, 0 }
 0x387   : > { %p2039_p10 = scmp.ge.s32.totalorder %s1463_s21, 2  ;;  %s965_s15 = scalar_lea.sflag [#allocation4], %s964_s12 }
 0x389   : > { %p1259_p0 = pnand %p2039_p10, %p2038_p8 }
 0x38b   : > { %1446 = dma.done.wait (!%p1259_p0), %s965_s15, 4096  }
 0x38c   : > { %1448 = vsyncadd (!%p1259_p0), %s965_s15, 4294963200  ;;  %p18_p2 = scmp.ge.s32.totalorder %s1527_s24, 4   ;;  %s2040_s18 = smov %s1455_s19 }
 0x38d   : > { %s2041_s19 = smov %s1459_s20  ;;  %s2042_s20 = smov %s1539_s27 }
 0x38e   : > { %s2043_s21 = smov %s1527_s24  ;;  %20 = sbr.rel (!%p18_p2) target bundleno = 5 (0x5), region = 85 }
 0x395   :  { %970 = vsyncpa [#allocation3], 1 }
 0x396   :  { %972 = vsyncpa [#allocation3 + $0x1], 1 }
 0x397   :  { %973 = vsyncpa [#allocation4], 1 }
 0x398   :  { %975 = vsyncpa [#allocation4 + $0x1], 1 }

</bundles_post_ra>
